<compile_context>
chip_gen: v6e
topology: v6e:2x2x1
jax: 0.10.0
libtpu: 0.0.40
codegen_flags: <defaults>
</compile_context>

<pallas_src>
import numpy as np
import jax
import jax.numpy as jnp
from jax.experimental import pallas as pl
from jax.experimental.pallas import tpu as pltpu

# --------------------- small config (consistent with EEGNetDecoder) ----------
CHUNK = 31    # chunk_size
E     = 8     # num_electrodes
F1    = 4
F2    = 8
D     = 2
L     = 32    # laten_size
K2    = 8     # kernel_2 (kernel_1 is unused by forward)
B     = 2     # batch
EPS   = 1e-3  # BatchNorm eps

F1D  = F1 * D
K1   = K2 * 4                     # block1 conv-t #1 kernel width
W1   = K1 - 4                     # width after conv-t #1 (padding (0,2) crops 2+2)
K2H  = K2 // 2                    # depthwise conv-t kernel width
W2   = W1 - 1 - K2H               # width after depthwise conv-t (padding crops)
WP   = (W2 - 1) // 2 + 1          # width after AvgPool2d((1,1), stride=2)
KF   = CHUNK + 1 - (WP - 1) * 2   # == valid_final_kernal_size()
W6   = (WP - 1) * 2 + KF          # width after block2 conv-t #2 (stride (1,2))
WFIN = W6 - 1                     # width after AvgPool2d((1,2), stride=1)
assert WFIN == CHUNK and KF >= 1 and E * W6 == 256


# ------------------------------- Pallas kernel --------------------------------
def _decoder_kernel(x_ref, m_ref, bias_ref, out_ref):
    # Pre-ELU affine chain folded into one bf16 MXU matmul + f32 bias.
    a = x_ref[...].astype(jnp.bfloat16)
    pre = jnp.dot(a, m_ref[...], preferred_element_type=jnp.float32)    # (B, E*W6)
    pre = pre + bias_ref[...]
    # ELU(alpha=1)
    elu = jnp.where(pre > 0, pre, jnp.exp(jnp.minimum(pre, 0.0)) - 1.0)
    # AvgPool2d((1,2), stride=1): 0.5*(x[w] + x[w+1]).  roll by (size-1) ==
    # roll by -1 (jnp.roll semantics); the wrapped last column of each
    # electrode slab is cropped in the wrapper, so wrap-around contamination
    # never reaches the final output.  XLU roll + VPU add, no second matmul.
    shifted = pltpu.roll(elu, shift=elu.shape[-1] - 1, axis=1)
    out_ref[...] = (0.5 * (elu + shifted)).astype(out_ref.dtype)        # (B, E*W6)


# ------------------------------- wrapper --------------------------------------
def eegnet_decoder_forward(x, kparams):
    m, bias = kparams
    b = x.shape[0]
    n_out = E * W6
    flops = 2 * b * L * n_out + 6 * b * n_out          # matmul + bias/ELU/pool
    bytes_accessed = (x.size * x.dtype.itemsize
                      + m.size * m.dtype.itemsize
                      + bias.size * bias.dtype.itemsize
                      + b * n_out * 4)
    out = pl.pallas_call(
        _decoder_kernel,
        out_shape=jax.ShapeDtypeStruct((b, n_out), jnp.float32),
        cost_estimate=pl.CostEstimate(
            flops=int(flops),
            transcendentals=int(b * n_out),
            bytes_accessed=int(bytes_accessed)),
    )(x, m, bias)
    # Crop the wrap-pooled last column of each electrode slab; NCHW like torch:
    # (B, 1, num_electrodes, chunk_size).
    return out.reshape(b, 1, E, W6)[..., :WFIN]


# -------------------- deterministic parameter construction --------------------
def init_torch_layout_params(key):
    ks = jax.random.split(key, 9)
    p = {
        "w_lin": 0.2 * jax.random.normal(ks[0], (L, F2)),            # lin.weight.T
        "w_ct1": 0.2 * jax.random.normal(ks[1], (F2, F1D, 1, K1)),   # ConvT(F2->F1D,(1,4K2))
        "w_ct2": 0.2 * jax.random.normal(ks[2], (F1D, 1, 1, K2H)),   # depthwise ConvT
        "g1":    1.0 + 0.1 * jax.random.normal(ks[3], (F1D,)),       # BN1 gamma
        "b1":    0.1 * jax.random.normal(ks[4], (F1D,)),             # BN1 beta
        "w_ct3": 0.5 * jax.random.normal(ks[5], (F1D, 1, E, 1)),     # grouped ConvT, max_norm=1
        "w_ct4": 0.2 * jax.random.normal(ks[6], (F1, 1, 1, KF)),     # ConvT(F1->1,(1,KF),s=(1,2))
        "g2":    1.0 + 0.1 * jax.random.normal(ks[7], (1,)),         # BN2 gamma
        "b2":    0.1 * jax.random.normal(ks[8], (1,)),               # BN2 beta
    }
    return {k: np.asarray(v, np.float32) for k, v in p.items()}


def renorm_maxnorm1(w):
    # torch.renorm(w, p=2, dim=0, maxnorm=1)
    n = np.sqrt((w.reshape(w.shape[0], -1) ** 2).sum(axis=1))
    s = np.where(n > 1.0, 1.0 / np.maximum(n, 1e-12), 1.0).astype(w.dtype)
    return w * s.reshape((-1,) + (1,) * (w.ndim - 1))


# --------------------------- numpy reference (torch semantics) ----------------
def np_conv_transpose2d(x, w, stride, padding, groups):
    Bn, Cin, H, W = x.shape
    _, Copg, kH, kW = w.shape
    Cout = Copg * groups
    sH, sW = stride
    pH, pW = padding
    Hf = (H - 1) * sH + kH
    Wf = (W - 1) * sW + kW
    dt = np.result_type(x.dtype, w.dtype)
    y = np.zeros((Bn, Cout, Hf, Wf), dt)
    cpg = Cin // groups
    for ci in range(Cin):
        g = ci // cpg
        for col in range(Copg):
            co = g * Copg + col
            for ih in range(H):
                for iw in range(W):
                    y[:, co, ih * sH:ih * sH + kH, iw * sW:iw * sW + kW] += (
                        x[:, ci, ih, iw][:, None, None] * w[ci, col][None])
    return y[:, :, pH:Hf - pH, pW:Wf - pW]


def np_batchnorm_eval(x, gamma, beta, eps):
    # running_mean = 0, running_var = 1 (freshly initialized module)
    g = gamma.reshape(1, -1, 1, 1) / np.sqrt(1.0 + eps)
    return x * g + beta.reshape(1, -1, 1, 1)


def np_avgpool2d(x, kernel, stride):
    kh, kw = kernel
    sh, sw = stride
    Bn, C, H, W = x.shape
    Ho = (H - kh) // sh + 1
    Wo = (W - kw) // sw + 1
    y = np.zeros((Bn, C, Ho, Wo), x.dtype)
    for i in range(Ho):
        for j in range(Wo):
            y[:, :, i, j] = x[:, :, i * sh:i * sh + kh,
                              j * sw:j * sw + kw].mean(axis=(-2, -1))
    return y


def _pre_elu_np(x2d, p, w5):
    """Everything in the forward pass before the ELU (affine in x2d)."""
    h = x2d @ p["w_lin"]
    t = h[:, :, None, None]
    t = np_conv_transpose2d(t, p["w_ct1"], (1, 1), (0, 2), 1)
    t = np_conv_transpose2d(t, p["w_ct2"], (1, 1), (0, K2H), F1D)
    t = np_batchnorm_eval(t, p["g1"], p["b1"], EPS)
    t = np_avgpool2d(t, (1, 1), (2, 2))
    t = np_conv_transpose2d(t, w5, (1, 1), (0, 0), F1)
    t = np_conv_transpose2d(t, p["w_ct4"], (1, 2), (0, 0), 1)
    t = np_batchnorm_eval(t, p["g2"], p["b2"], EPS)
    return t.reshape(x2d.shape[0], E * W6)


def prepare_kernel_params(p):
    """Host-side float64 fold of the pre-ELU affine chain; M shipped as bf16."""
    p64 = {k: v.astype(np.float64) for k, v in p.items()}
    w5 = renorm_maxnorm1(p64["w_ct3"])
    bias = _pre_elu_np(np.zeros((1, L), np.float64), p64, w5)          # (1, E*W6)
    m = _pre_elu_np(np.eye(L, dtype=np.float64), p64, w5) - bias       # (L, E*W6)
    return (jnp.asarray(m, jnp.bfloat16),     # MXU sees bf16 anyway; halves DMA
            jnp.asarray(bias, jnp.float32))


def reference_forward(x, p):
    h = x @ p["w_lin"]
    t = h[:, :, None, None]
    t = np_conv_transpose2d(t, p["w_ct1"], (1, 1), (0, 2), 1)
    t = np_conv_transpose2d(t, p["w_ct2"], (1, 1), (0, K2H), F1D)
    t = np_batchnorm_eval(t, p["g1"], p["b1"], EPS)
    t = np_avgpool2d(t, (1, 1), (2, 2))
    t = np_conv_transpose2d(t, renorm_maxnorm1(p["w_ct3"]), (1, 1), (0, 0), F1)
    t = np_conv_transpose2d(t, p["w_ct4"], (1, 2), (0, 0), 1)
    t = np_batchnorm_eval(t, p["g2"], p["b2"], EPS)
    t = np.where(t > 0, t, np.exp(np.minimum(t, 0.0)) - 1.0)           # ELU
    t = np_avgpool2d(t, (1, 2), (1, 1))
    return t                                                            # Dropout = id (eval)


# ------------------------------------ main -------------------------------------
if __name__ == "__main__":
    key = jax.random.PRNGKey(0)
    kp, kx = jax.random.split(key)
    params_np = init_torch_layout_params(kp)
    x_np = np.asarray(jax.random.normal(kx, (B, L)), np.float32)

    kparams = prepare_kernel_params(params_np)
    out = eegnet_decoder_forward(jnp.asarray(x_np), kparams)
    out = jax.block_until_ready(out)

    ref = reference_forward(x_np, params_np)
    assert out.shape == (B, 1, E, CHUNK), out.shape
    err = float(np.max(np.abs(np.asarray(out) - ref)) / (np.max(np.abs(ref)) + 1e-6))
    assert err < 1e-2, f"max relative error too large: {err}"
    print("KERNEL_OK")
</pallas_src>

<mosaic_0001>
module attributes {stable_mosaic.version = 11 : i64} {
  func.func @_decoder_kernel(%arg0: memref<2x32xf32, #tpu.memory_space<vmem>>, %arg1: memref<32x256xbf16, #tpu.memory_space<vmem>>, %arg2: memref<1x256xf32, #tpu.memory_space<vmem>>, %arg3: memref<2x256xf32, #tpu.memory_space<vmem>>) attributes {dimension_semantics = [], scalar_prefetch = 0 : i64, scratch_operands = 0 : i64, tpu.core_type = #tpu.core_type<tc>} {
    %c0 = arith.constant 0 : index
    %c0_0 = arith.constant 0 : index
    %0 = vector.load %arg0[%c0, %c0_0] : memref<2x32xf32, #tpu.memory_space<vmem>>, vector<2x32xf32>
    %1 = arith.truncf %0 : vector<2x32xf32> to vector<2x32xbf16>
    %c0_1 = arith.constant 0 : index
    %c0_2 = arith.constant 0 : index
    %2 = vector.load %arg1[%c0_1, %c0_2] : memref<32x256xbf16, #tpu.memory_space<vmem>>, vector<32x256xbf16>
    %cst = arith.constant dense<0.000000e+00> : vector<2x256xf32>
    %3 = tpu.matmul %1, %2, %cst {dimension_numbers = #tpu.dot_dimension_numbers<[1], [0], [0], [1], [0, 0, 1, 1], [], []>} : vector<2x32xbf16>, vector<32x256xbf16>, vector<2x256xf32> -> vector<2x256xf32>
    %c0_3 = arith.constant 0 : index
    %c0_4 = arith.constant 0 : index
    %4 = vector.load %arg2[%c0_3, %c0_4] : memref<1x256xf32, #tpu.memory_space<vmem>>, vector<1x256xf32>
    %5 = vector.broadcast %4 : vector<1x256xf32> to vector<2x256xf32>
    %6 = arith.addf %3, %5 : vector<2x256xf32>
    %cst_5 = arith.constant 0.000000e+00 : f32
    %7 = vector.broadcast %cst_5 : f32 to vector<2x256xf32>
    %8 = arith.cmpf ogt, %6, %7 : vector<2x256xf32>
    %cst_6 = arith.constant 0.000000e+00 : f32
    %9 = vector.broadcast %cst_6 : f32 to vector<2x256xf32>
    %10 = arith.minimumf %6, %9 : vector<2x256xf32>
    %11 = math.exp %10 : vector<2x256xf32>
    %cst_7 = arith.constant 1.000000e+00 : f32
    %12 = vector.broadcast %cst_7 : f32 to vector<2x256xf32>
    %13 = arith.subf %11, %12 : vector<2x256xf32>
    %14 = arith.select %8, %6, %13 : vector<2x256xi1>, vector<2x256xf32>
    %c255_i32 = arith.constant 255 : i32
    %15 = tpu.dynamic_rotate %14 by %c255_i32 dim 1 : vector<2x256xf32>, i32 -> vector<2x256xf32>
    %16 = arith.addf %14, %15 : vector<2x256xf32>
    %cst_8 = arith.constant 5.000000e-01 : f32
    %17 = vector.broadcast %cst_8 : f32 to vector<2x256xf32>
    %18 = arith.mulf %17, %16 : vector<2x256xf32>
    %c0_9 = arith.constant 0 : index
    %c0_10 = arith.constant 0 : index
    %19 = vector.load %arg3[%c0_9, %c0_10] : memref<2x256xf32, #tpu.memory_space<vmem>>, vector<2x256xf32>
    tpu.vector_store %arg3[%c0_9, %c0_10], %18 {strides = array<i32>} : memref<2x256xf32, #tpu.memory_space<vmem>>, vector<2x256xf32>,
    return
  }
}

</mosaic_0001>

<bundles_post_ra>
// kernel: tpu_custom_call.1
= control target key start
LH: loop header
LB: loop body
LE: loop exit
PB: predicated region body
PF: predicated region fallthrough
CT: control target
= control target key end

     0   :  { %8 = vsyncpa [#allocation3], 0  ;;  %s308_s0 = inlined_call_operand.hbm [shape: f32[2,32], index: 0, kind: input, shape index: {}]   ;;  %s309_s1 = inlined_call_operand.hbm [shape: bf16[32,256], index: 1, kind: input, shape index: {}]   ;;  %s310_s2 = inlined_call_operand.vmem [shape: f32[1,256], index: 2, kind: input, shape index: {}]   ;;  %s311_s3 = inlined_call_operand.hbm [shape: f32[2,256], index: 3, kind: output, shape index: {}]  }
   0x1   :  { %9 = vsyncpa [#allocation6], 0 }
   0x2   :  { %10 = vsyncpa [#allocation4], 0  ;;  %s269_s12 = smov [#allocation2]   ;;  %s270_s14 = smov [#allocation5]  }
   0x3   :  { %s17_s13 = sshll.u32 %s269_s12, 4  ;;  %s26_s15 = sshll.u32 %s270_s14, 4  ;;  %s18_s13 = int_to_ptr.vmem [resolvable:$true] %s17_s13  ;;  %s27_s15 = int_to_ptr.vmem [resolvable:$true] %s26_s15 }
   0x4   :  { %s211_s16 = scalar_lea.vmem %s18_s13, 32  ;;  %p216_p1 = scmp.lt.s32.totalorder %s18_s13, %s18_s13 }
   0x5   :  { %p212_p0 = scmp.ne.s32.totalorder %s18_s13, %s211_s16  ;;  %p217_p2 = scmp.lt.s32.totalorder %s211_s16, %s211_s16 }
   0x7   :  { %p218_p3 = por %p217_p2, %p216_p1 }
   0x9   :  { %p219_p4 = pnand %p218_p3, %p212_p0 }
   0xb   :  { %222 = shalt.err (!%p219_p4)
}
   0xc   :  { %20 = dma.hbm_to_vmem [thread:$0]  %s308_s0, 32, %s18_s13, [#allocation3]  }
   0xd   :  { %s231_s19 = scalar_lea.vmem %s27_s15, 512  ;;  %p236_p6 = scmp.lt.s32.totalorder %s27_s15, %s27_s15 }
   0xe   :  { %p232_p5 = scmp.ne.s32.totalorder %s27_s15, %s231_s19  ;;  %p237_p7 = scmp.lt.s32.totalorder %s231_s19, %s231_s19 }
  0x10   :  { %p238_p8 = por %p237_p7, %p236_p6 }
  0x12   :  { %p239_p9 = pnand %p238_p8, %p232_p5 }
  0x14   :  { %242 = shalt.err (!%p239_p9)
}
  0x15   :  { %s271_s20 = smov 128   ;;  %s272_s21 = smov 8  }
  0x16   :  { %32 = dma.hbm_to_vmem [thread:$0]  %s309_s1, 512, %s27_s15, [#allocation6], %s271_s20, %s271_s20, %s272_s21  }
  0x17   :  { %263 = dma.done.wait [#allocation3], 32  }
  0x18   :  { %264 = vsyncadd [#allocation3], 4294967264 }
  0x19   :  { %265 = dma.done.wait [#allocation6], 512  }
  0x1a   :  { %266 = vsyncadd [#allocation6], 4294966784  ;;  %v273_v0 = vmov 0   ;;  %v193_v1 = vld [vmem:[#allocation5 + $0x14] ss:$8 sps:$4 sm:$0xff]   ;;  %vm80_vm0 = vcmask 261120   ;;  %v50_v7 = vlaneseq }
  0x1b   :  { %116 = vmatprep.mubr.bf16.mxu0 %v273_v0  ;;  %v195_v2 = vld [vmem:[#allocation5 + $0x10] ss:$8 sps:$4 sm:$0xff]   ;;  %96 = vmatprep.subr.bf16.mxu0 %v193_v1  ;;  %v196_v3 = vld [vmem:[#allocation5 + $0x4] ss:$8 sps:$4 sm:$0xff]   ;;  %v198_v4 = vld [vmem:[#allocation5] ss:$8 sps:$4 sm:$0xff]  }
  0x1c   :  { %97 = vmatpush1.bf16.msra.mxu0 %v195_v2  ;;  %v42_v5 = vld [vmem:[#allocation2] sm:$0x3]  ;;  %v51_v8 = vshrl.u32 %v50_v7, 7  ;;  %v142_v30 = vand.u32 127, %v50_v7  ;;  %s275_s24 = smov [#allocation7]  }
  0x1d   :  { %98 = vmatprep.subr.bf16.mxu0 %v196_v3  ;;  %v43_v6 = vpack.c.bf16 %v42_v5, %v42_v5  ;;  %v48_v10 = vld [vmem:[%s310_s2] sm:$0x3]  ;;  %s274_s2 = smov 127   ;;  %s168_s25 = sshll.u32 %s275_s24, 4  ;;  %s169_s25 = int_to_ptr.vmem [resolvable:$true] %s168_s25 }
  0x1e   :  { %v52_v9 = vsub.s32 0, %v51_v8  ;;  %v56_v11 = vsub.s32 1, %v51_v8  ;;  %vm143_vm3 = vcmp.lt.s32.totalorder %v142_v30, 127  ;;  %s243_s26 = scalar_lea.vmem %s169_s25, 64  ;;  %p248_p11 = scmp.lt.s32.totalorder %s169_s25, %s169_s25 }
  0x1f   :  { %p244_p10 = scmp.ne.s32.totalorder %s169_s25, %s243_s26  ;;  %p249_p12 = scmp.lt.s32.totalorder %s243_s26, %s243_s26 }
  0x20   :  { %99 = vmatpush1.bf16.msra.mxu0 %v198_v4  ;;  %v53_v12 = vrot.slane %v48_v10, %v52_v9  ;;  %v57_v13 = vrot.slane %v48_v10, %v56_v11 }
  0x21   :  { %p250_p13 = por %p249_p12, %p248_p11 }
  0x23   :  { %182 = vmatmul.mubr.msk.bf16.vlgmr.msra.gmra.mxu0 %vm80_vm0, %v43_v6  ;;  %p251_p0 = pnand %p250_p13, %p244_p10 }
  0xe3   :  { %v118_v14 = vpop.f32.mrf.mxu0 }
  0xe4   :  { %v119_v15 = vadd.f32 %v118_v14, %v53_v12 }
  0xe5   :  { %v120_v16 = vpop.f32.mrf.mxu0 }
  0xe6   :  { %v127_v17 = vmin.f32 %v119_v15, 0.0  ;;  %v121_v18 = vadd.f32 %v120_v16, %v57_v13  ;;  %vm125_vm1 = vcmp.gt.f32.partialorder %v119_v15, 0.0 }
  0xe7   :  { %v122_v19 = vpop.f32.mrf.mxu0 }
  0xe8   :  { %v129_v20 = vmul.f32 1.442695, %v127_v17  ;;  %v128_v21 = vmin.f32 %v121_v18, 0.0  ;;  %vm126_vm2 = vcmp.gt.f32.partialorder %v121_v18, 0.0 }
  0xe9   :  { %v123_v22 = vpop.f32.mrf.mxu0 }
  0xea   :  { %199 = vpow2.f32 %v129_v20  ;;  %v131_v23 = vmul.f32 1.442695, %v128_v21 }
  0xec   :  { %201 = vpow2.f32 %v131_v23 }
  0xf7   :  { %v200_v24 = vpop.eup %199 }
  0xf8   :  { %v183_v25 = vadd.f32 -1.0, %v200_v24 }
  0xf9   :  { %v202_v26 = vpop.eup %201 }
  0xfa   :  { %v135_v27 = vsel %vm125_vm1, %v119_v15, %v183_v25  ;;  %v184_v28 = vadd.f32 -1.0, %v202_v26 }
  0xfb   :  { %137 = vrot.lane.b32.xlu0 %v135_v27, %s274_s2 }
  0xfc   :  { %v136_v29 = vsel %vm126_vm2, %v121_v18, %v184_v28 }
  0xff   :  { %139 = vrot.lane.b32.xlu0 %v136_v29, %s274_s2 }
 0x16d   :  { %v138_v31 = vpop.permute.xlu0 %137 }
 0x171   :  { %v140_v32 = vpop.permute.xlu0 %139 }
 0x172   :  { %v144_v33 = vsel %vm143_vm3, %v138_v31, %v140_v32  ;;  %v145_v34 = vsel %vm143_vm3, %v140_v32, %v138_v31 }
 0x173   :  { %v146_v35 = vadd.f32 %v144_v33, %v135_v27  ;;  %v147_v36 = vadd.f32 %v145_v34, %v136_v29 }
 0x175   :  { %v148_v37 = vmul.f32 0.5, %v146_v35  ;;  %v149_v38 = vmul.f32 0.5, %v147_v36 }
 0x177   :  { %v152_v39 = vcombine.low %v148_v37, %v149_v38 }
 0x179   :  { %185 = vst.sshfl [vmem:[#allocation7] sm:$0x33 pattern:$0x76325410] %v152_v39 }
 0x17a   :  { %254 = shalt.err (!%p251_p0)
}
 0x17b   :  { %171 = dma.vmem_to_hbm [thread:$0]  %s169_s25, 64, %s311_s3, [#allocation4]  }
 0x17c   :  { %267 = dma.done.wait [#allocation4], 64  }
 0x17d   :  { %268 = vsyncadd [#allocation4], 4294967232 }
 0x17e   :  { %175 = vsyncpa [#allocation3], 1 }
 0x17f   :  { %176 = vsyncpa [#allocation6], 1 }
 0x180   :  { %177 = vsyncpa [#allocation4], 1 }

</bundles_post_ra>
